<compile_context>
chip_gen: v5e
topology: v5e:2x2
jax: 0.10.0
libtpu: 0.0.40
codegen_flags: <defaults>
</compile_context>

<pallas_src>
import jax
import jax.numpy as jnp
from jax.experimental import pallas as pl
from jax.experimental.pallas import tpu as pltpu


INV_SQRT2 = 0.7071067811865476


def senticls_kernel(au_ref, em_ref, hp_ref, bp_ref,
                    w1_ref, b1_ref, w2_ref, b2_ref,
                    out_ref, pooled_ref):
    # Grid: (batch tile i, sequence tile k); k is the reduction axis.
    k = pl.program_id(1)

    @pl.when(k == 0)
    def _init():
        pooled_ref[...] = jnp.zeros_like(pooled_ref)

    # Temporal pooling: accumulate the S-sum of this sequence block per
    # modality in f32.  Inputs may be bf16 -- cast before the add (v5e has no
    # bf16 VALU).  The 1/S mean scale is folded into W1 on the host.
    for m, xr in enumerate((au_ref, em_ref, hp_ref, bp_ref)):
        pooled_ref[m] = pooled_ref[m] + jnp.sum(
            xr[...].astype(jnp.float32), axis=1)

    # Dropout(p=0.1) is identity in eval/inference mode; intentionally a no-op.
    # TODO(synk): training-mode dropout (pltpu.prng_*) not implemented.

    @pl.when(k == pl.num_programs(1) - 1)
    def _finalize():
        # Linear(fusion_dim, fusion_dim//2): four per-modality MXU matmuls
        # (bf16 operands, f32 accumulation) summed == concat(pooled) @ W1.
        h = jnp.dot(pooled_ref[0].astype(jnp.bfloat16), w1_ref[0],
                    preferred_element_type=jnp.float32)
        for m in range(1, 4):
            h = h + jnp.dot(pooled_ref[m].astype(jnp.bfloat16), w1_ref[m],
                            preferred_element_type=jnp.float32)
        h = h + b1_ref[...]

        # Exact (erf-based) GELU, matching nn.GELU() default, in f32.
        h = 0.5 * h * (1.0 + jax.lax.erf(h * INV_SQRT2))

        # Linear(fusion_dim//2, n_class), zero-padded to 128 output lanes so
        # the store is an unmasked, lane-dense vst.
        out = jnp.dot(h.astype(jnp.bfloat16), w2_ref[...],
                      preferred_element_type=jnp.float32) + b2_ref[...]
        out_ref[...] = out.astype(out_ref.dtype)


def _pick_seq_tile(S, tile_b, D, x_itemsize, budget_bytes=4 << 20):
    """Largest sequence tile whose 4-modality block fits `budget_bytes`
    (single buffer) and divides S exactly (so no padded rows enter the sum)."""
    per_seq_row = 4 * tile_b * D * x_itemsize
    cap = max(8, budget_bytes // max(1, per_seq_row))
    if S <= cap:
        return S
    t = (cap // 8) * 8
    while t >= 8:
        if S % t == 0:
            return t
        t -= 8
    return S  # no nice divisor found: fall back to one whole-S block


def senticls_forward(feats, params):
    """feats: dict with 'au','em','hp','bp', each [B, S, D] (same S), any float
    dtype (bf16 recommended -- passed straight to the kernel, no host pre-pass).
    params: (w1, b1, w2, b2) with weights stored [in, out] (x @ W + b)."""
    order = ("au", "em", "hp", "bp")
    xs = [feats[t] for t in order]
    B, S, D = xs[0].shape
    x_itemsize = jnp.dtype(xs[0].dtype).itemsize

    w1, b1, w2, b2 = params
    fusion_dim, hidden = w1.shape
    n_class = w2.shape[1]
    assert fusion_dim == 4 * D

    n_pad = ((n_class + 127) // 128) * 128

    # Host-side weight prep (tiny, O(fusion_dim*hidden)): fold the 1/S mean
    # scale into W1, split it into 4 per-modality row blocks [4, D, hidden],
    # cast to bf16 for the MXU; zero-pad W2/b2 to a lane-dense 128-wide output.
    w1_k = ((w1.astype(jnp.float32) * (1.0 / S))
            .reshape(4, D, hidden).astype(jnp.bfloat16))
    b1_k = b1.reshape(1, hidden).astype(jnp.float32)
    w2_k = (jnp.zeros((hidden, n_pad), jnp.float32)
            .at[:, :n_class].set(w2.astype(jnp.float32)).astype(jnp.bfloat16))
    b2_k = (jnp.zeros((1, n_pad), jnp.float32)
            .at[:, :n_class].set(b2.reshape(1, n_class).astype(jnp.float32)))

    # Fixed batch tile (keeps VMEM bounded, >=2 grid steps for megacore when
    # B is large); ragged last batch block is handled by cdiv + Pallas padding
    # (harmless: every op here is row-independent and padded rows are dropped).
    tile_b = B if B <= 128 else 128
    tile_s = _pick_seq_tile(S, tile_b, D, x_itemsize)
    grid = (pl.cdiv(B, tile_b), S // tile_s)

    x_spec = pl.BlockSpec((tile_b, tile_s, D), lambda i, k: (i, k, 0))

    out_pad = pl.pallas_call(
        senticls_kernel,
        out_shape=jax.ShapeDtypeStruct((B, n_pad), jnp.float32),
        grid=grid,
        in_specs=[
            x_spec, x_spec, x_spec, x_spec,
            pl.BlockSpec((4, D, hidden), lambda i, k: (0, 0, 0)),
            pl.BlockSpec((1, hidden), lambda i, k: (0, 0)),
            pl.BlockSpec((hidden, n_pad), lambda i, k: (0, 0)),
            pl.BlockSpec((1, n_pad), lambda i, k: (0, 0)),
        ],
        out_specs=pl.BlockSpec((tile_b, n_pad), lambda i, k: (i, 0)),
        scratch_shapes=[pltpu.VMEM((4, tile_b, D), jnp.float32)],
        compiler_params=pltpu.CompilerParams(
            dimension_semantics=("parallel", "arbitrary"),
            vmem_limit_bytes=32 * 1024 * 1024),
    )(xs[0], xs[1], xs[2], xs[3], w1_k, b1_k, w2_k, b2_k)

    # Slice off the lane padding (tiny: B x 128 -> B x n_class).
    return out_pad[:, :n_class]


def init_params(key, fusion_dim, n_class):
    hidden = fusion_dim // 2
    k1, k2, k3, k4 = jax.random.split(key, 4)
    # deterministic synthetic init (uniform, roughly PyTorch-Linear-like scale)
    s1 = 1.0 / jnp.sqrt(fusion_dim)
    s2 = 1.0 / jnp.sqrt(hidden)
    w1 = jax.random.uniform(k1, (fusion_dim, hidden), jnp.float32, -s1, s1)
    b1 = jax.random.uniform(k2, (hidden,), jnp.float32, -s1, s1)
    w2 = jax.random.uniform(k3, (hidden, n_class), jnp.float32, -s2, s2)
    b2 = jax.random.uniform(k4, (n_class,), jnp.float32, -s2, s2)
    return w1, b1, w2, b2


if __name__ == "__main__":
    B, S, D = 2, 8, 32          # per-modality feature dim
    fusion_dim = 4 * D          # 128 after (implicit) concatenation of 4 modalities
    n_class = 3

    key = jax.random.PRNGKey(0)
    kau, kem, khp, kbp, kp = jax.random.split(key, 5)
    # Upstream is assumed to hand over bf16 activations: the wrapper does NO
    # host-side concat/cast pre-pass and the kernel DMAs half the f32 bytes.
    feats = {
        "au": jax.random.normal(kau, (B, S, D), jnp.float32).astype(jnp.bfloat16),
        "em": jax.random.normal(kem, (B, S, D), jnp.float32).astype(jnp.bfloat16),
        "hp": jax.random.normal(khp, (B, S, D), jnp.float32).astype(jnp.bfloat16),
        "bp": jax.random.normal(kbp, (B, S, D), jnp.float32).astype(jnp.bfloat16),
    }
    params = init_params(kp, fusion_dim, n_class)

    out = senticls_forward(feats, params)
    jax.block_until_ready(out)

    # Pure-JAX f32 reference with the original module's semantics
    # (mean -> concat -> Linear -> exact GELU -> Linear) on the same
    # (bf16-rounded) inputs.  Tolerance covers the kernel's bf16 MXU operands.
    x = jnp.concatenate(
        [jnp.mean(feats[t].astype(jnp.float32), axis=1)
         for t in ("au", "em", "hp", "bp")], axis=-1)
    w1, b1, w2, b2 = params
    h = x @ w1 + b1
    h = 0.5 * h * (1.0 + jax.lax.erf(h * INV_SQRT2))
    ref = h @ w2 + b2

    assert out.shape == (B, n_class)
    assert jnp.allclose(out, ref, atol=2e-2, rtol=2e-2)

    print("KERNEL_OK")
</pallas_src>

<mosaic_0001>
module attributes {stable_mosaic.version = 11 : i64} {
  func.func @senticls_kernel(%arg0: i32, %arg1: i32, %arg2: memref<2x8x32xbf16, #tpu.memory_space<vmem>>, %arg3: memref<2x8x32xbf16, #tpu.memory_space<vmem>>, %arg4: memref<2x8x32xbf16, #tpu.memory_space<vmem>>, %arg5: memref<2x8x32xbf16, #tpu.memory_space<vmem>>, %arg6: memref<4x32x64xbf16, #tpu.memory_space<vmem>>, %arg7: memref<1x64xf32, #tpu.memory_space<vmem>>, %arg8: memref<64x128xbf16, #tpu.memory_space<vmem>>, %arg9: memref<1x128xf32, #tpu.memory_space<vmem>>, %arg10: memref<2x128xf32, #tpu.memory_space<vmem>>, %arg11: memref<4x2x32xf32, #tpu.memory_space<vmem>>) attributes {dimension_semantics = [#tpu.dimension_semantics<parallel>, #tpu.dimension_semantics<arbitrary>], iteration_bounds = array<i64: 1, 1>, scalar_prefetch = 0 : i64, scratch_operands = 1 : i64, tpu.core_type = #tpu.core_type<tc>, window_params = [{transform_indices = @transform_0, window_bounds = array<i64: 2, 8, 32>}, {transform_indices = @transform_1, window_bounds = array<i64: 2, 8, 32>}, {transform_indices = @transform_2, window_bounds = array<i64: 2, 8, 32>}, {transform_indices = @transform_3, window_bounds = array<i64: 2, 8, 32>}, {pipeline_mode = #tpu.pipeline_mode<synchronous>, transform_indices = @transform_4, window_bounds = array<i64: 4, 32, 64>}, {pipeline_mode = #tpu.pipeline_mode<synchronous>, transform_indices = @transform_5, window_bounds = array<i64: 1, 64>}, {pipeline_mode = #tpu.pipeline_mode<synchronous>, transform_indices = @transform_6, window_bounds = array<i64: 64, 128>}, {pipeline_mode = #tpu.pipeline_mode<synchronous>, transform_indices = @transform_7, window_bounds = array<i64: 1, 128>}, {transform_indices = @transform_8, window_bounds = array<i64: 2, 128>}]} {
    %c0_i32 = arith.constant 0 : i32
    %0 = arith.cmpi eq, %arg1, %c0_i32 : i32
    %1 = arith.extui %0 : i1 to i32
    %c0_i32_0 = arith.constant 0 : i32
    %2 = arith.cmpi ne, %1, %c0_i32_0 : i32
    scf.if %2 {
      %cst_38 = arith.constant 0.000000e+00 : f32
      %42 = vector.broadcast %cst_38 : f32 to vector<4x2x32xf32>
      %c0_39 = arith.constant 0 : index
      %c0_40 = arith.constant 0 : index
      %c0_41 = arith.constant 0 : index
      %43 = vector.load %arg11[%c0_39, %c0_40, %c0_41] : memref<4x2x32xf32, #tpu.memory_space<vmem>>, vector<4x2x32xf32>
      tpu.vector_store %arg11[%c0_39, %c0_40, %c0_41], %42 {strides = array<i32>} : memref<4x2x32xf32, #tpu.memory_space<vmem>>, vector<4x2x32xf32>,
    } else {
    }
    %c0 = arith.constant 0 : index
    %c0_1 = arith.constant 0 : index
    %c0_2 = arith.constant 0 : index
    %3 = vector.load %arg11[%c0, %c0_1, %c0_2] : memref<4x2x32xf32, #tpu.memory_space<vmem>>, vector<1x2x32xf32>
    %4 = vector.shape_cast %3 : vector<1x2x32xf32> to vector<2x32xf32>
    %c0_3 = arith.constant 0 : index
    %c0_4 = arith.constant 0 : index
    %c0_5 = arith.constant 0 : index
    %5 = vector.load %arg2[%c0_3, %c0_4, %c0_5] : memref<2x8x32xbf16, #tpu.memory_space<vmem>>, vector<2x8x32xbf16>
    %6 = arith.extf %5 : vector<2x8x32xbf16> to vector<2x8x32xf32>
    %cst = arith.constant dense<0.000000e+00> : vector<2x32xf32>
    %7 = vector.multi_reduction <add>, %6, %cst [1] : vector<2x8x32xf32> to vector<2x32xf32>
    %8 = arith.addf %4, %7 : vector<2x32xf32>
    %c0_6 = arith.constant 0 : index
    %c0_7 = arith.constant 0 : index
    %c0_8 = arith.constant 0 : index
    %9 = vector.load %arg11[%c0_6, %c0_7, %c0_8] : memref<4x2x32xf32, #tpu.memory_space<vmem>>, vector<1x2x32xf32>
    %10 = vector.shape_cast %9 : vector<1x2x32xf32> to vector<2x32xf32>
    %11 = vector.shape_cast %8 : vector<2x32xf32> to vector<1x2x32xf32>
    tpu.vector_store %arg11[%c0_6, %c0_7, %c0_8], %11 {strides = array<i32>} : memref<4x2x32xf32, #tpu.memory_space<vmem>>, vector<1x2x32xf32>,
    %c1 = arith.constant 1 : index
    %c0_9 = arith.constant 0 : index
    %c0_10 = arith.constant 0 : index
    %12 = vector.load %arg11[%c1, %c0_9, %c0_10] : memref<4x2x32xf32, #tpu.memory_space<vmem>>, vector<1x2x32xf32>
    %13 = vector.shape_cast %12 : vector<1x2x32xf32> to vector<2x32xf32>
    %c0_11 = arith.constant 0 : index
    %c0_12 = arith.constant 0 : index
    %c0_13 = arith.constant 0 : index
    %14 = vector.load %arg3[%c0_11, %c0_12, %c0_13] : memref<2x8x32xbf16, #tpu.memory_space<vmem>>, vector<2x8x32xbf16>
    %15 = arith.extf %14 : vector<2x8x32xbf16> to vector<2x8x32xf32>
    %cst_14 = arith.constant dense<0.000000e+00> : vector<2x32xf32>
    %16 = vector.multi_reduction <add>, %15, %cst_14 [1] : vector<2x8x32xf32> to vector<2x32xf32>
    %17 = arith.addf %13, %16 : vector<2x32xf32>
    %c1_15 = arith.constant 1 : index
    %c0_16 = arith.constant 0 : index
    %c0_17 = arith.constant 0 : index
    %18 = vector.load %arg11[%c1_15, %c0_16, %c0_17] : memref<4x2x32xf32, #tpu.memory_space<vmem>>, vector<1x2x32xf32>
    %19 = vector.shape_cast %18 : vector<1x2x32xf32> to vector<2x32xf32>
    %20 = vector.shape_cast %17 : vector<2x32xf32> to vector<1x2x32xf32>
    tpu.vector_store %arg11[%c1_15, %c0_16, %c0_17], %20 {strides = array<i32>} : memref<4x2x32xf32, #tpu.memory_space<vmem>>, vector<1x2x32xf32>,
    %c2 = arith.constant 2 : index
    %c0_18 = arith.constant 0 : index
    %c0_19 = arith.constant 0 : index
    %21 = vector.load %arg11[%c2, %c0_18, %c0_19] : memref<4x2x32xf32, #tpu.memory_space<vmem>>, vector<1x2x32xf32>
    %22 = vector.shape_cast %21 : vector<1x2x32xf32> to vector<2x32xf32>
    %c0_20 = arith.constant 0 : index
    %c0_21 = arith.constant 0 : index
    %c0_22 = arith.constant 0 : index
    %23 = vector.load %arg4[%c0_20, %c0_21, %c0_22] : memref<2x8x32xbf16, #tpu.memory_space<vmem>>, vector<2x8x32xbf16>
    %24 = arith.extf %23 : vector<2x8x32xbf16> to vector<2x8x32xf32>
    %cst_23 = arith.constant dense<0.000000e+00> : vector<2x32xf32>
    %25 = vector.multi_reduction <add>, %24, %cst_23 [1] : vector<2x8x32xf32> to vector<2x32xf32>
    %26 = arith.addf %22, %25 : vector<2x32xf32>
    %c2_24 = arith.constant 2 : index
    %c0_25 = arith.constant 0 : index
    %c0_26 = arith.constant 0 : index
    %27 = vector.load %arg11[%c2_24, %c0_25, %c0_26] : memref<4x2x32xf32, #tpu.memory_space<vmem>>, vector<1x2x32xf32>
    %28 = vector.shape_cast %27 : vector<1x2x32xf32> to vector<2x32xf32>
    %29 = vector.shape_cast %26 : vector<2x32xf32> to vector<1x2x32xf32>
    tpu.vector_store %arg11[%c2_24, %c0_25, %c0_26], %29 {strides = array<i32>} : memref<4x2x32xf32, #tpu.memory_space<vmem>>, vector<1x2x32xf32>,
    %c3 = arith.constant 3 : index
    %c0_27 = arith.constant 0 : index
    %c0_28 = arith.constant 0 : index
    %30 = vector.load %arg11[%c3, %c0_27, %c0_28] : memref<4x2x32xf32, #tpu.memory_space<vmem>>, vector<1x2x32xf32>
    %31 = vector.shape_cast %30 : vector<1x2x32xf32> to vector<2x32xf32>
    %c0_29 = arith.constant 0 : index
    %c0_30 = arith.constant 0 : index
    %c0_31 = arith.constant 0 : index
    %32 = vector.load %arg5[%c0_29, %c0_30, %c0_31] : memref<2x8x32xbf16, #tpu.memory_space<vmem>>, vector<2x8x32xbf16>
    %33 = arith.extf %32 : vector<2x8x32xbf16> to vector<2x8x32xf32>
    %cst_32 = arith.constant dense<0.000000e+00> : vector<2x32xf32>
    %34 = vector.multi_reduction <add>, %33, %cst_32 [1] : vector<2x8x32xf32> to vector<2x32xf32>
    %35 = arith.addf %31, %34 : vector<2x32xf32>
    %c3_33 = arith.constant 3 : index
    %c0_34 = arith.constant 0 : index
    %c0_35 = arith.constant 0 : index
    %36 = vector.load %arg11[%c3_33, %c0_34, %c0_35] : memref<4x2x32xf32, #tpu.memory_space<vmem>>, vector<1x2x32xf32>
    %37 = vector.shape_cast %36 : vector<1x2x32xf32> to vector<2x32xf32>
    %38 = vector.shape_cast %35 : vector<2x32xf32> to vector<1x2x32xf32>
    tpu.vector_store %arg11[%c3_33, %c0_34, %c0_35], %38 {strides = array<i32>} : memref<4x2x32xf32, #tpu.memory_space<vmem>>, vector<1x2x32xf32>,
    %c0_i32_36 = arith.constant 0 : i32
    %39 = arith.cmpi eq, %arg1, %c0_i32_36 : i32
    %40 = arith.extui %39 : i1 to i32
    %c0_i32_37 = arith.constant 0 : i32
    %41 = arith.cmpi ne, %40, %c0_i32_37 : i32
    scf.if %41 {
      %c0_38 = arith.constant 0 : index
      %c0_39 = arith.constant 0 : index
      %c0_40 = arith.constant 0 : index
      %42 = vector.load %arg11[%c0_38, %c0_39, %c0_40] : memref<4x2x32xf32, #tpu.memory_space<vmem>>, vector<1x2x32xf32>
      %43 = vector.shape_cast %42 : vector<1x2x32xf32> to vector<2x32xf32>
      %44 = arith.truncf %43 : vector<2x32xf32> to vector<2x32xbf16>
      %c0_41 = arith.constant 0 : index
      %c0_42 = arith.constant 0 : index
      %c0_43 = arith.constant 0 : index
      %45 = vector.load %arg6[%c0_41, %c0_42, %c0_43] : memref<4x32x64xbf16, #tpu.memory_space<vmem>>, vector<1x32x64xbf16>
      %46 = vector.shape_cast %45 : vector<1x32x64xbf16> to vector<32x64xbf16>
      %cst_44 = arith.constant dense<0.000000e+00> : vector<2x64xf32>
      %47 = tpu.matmul %44, %46, %cst_44 {dimension_numbers = #tpu.dot_dimension_numbers<[1], [0], [0], [1], [0, 0, 1, 1], [], []>} : vector<2x32xbf16>, vector<32x64xbf16>, vector<2x64xf32> -> vector<2x64xf32>
      %c1_45 = arith.constant 1 : index
      %c0_46 = arith.constant 0 : index
      %c0_47 = arith.constant 0 : index
      %48 = vector.load %arg11[%c1_45, %c0_46, %c0_47] : memref<4x2x32xf32, #tpu.memory_space<vmem>>, vector<1x2x32xf32>
      %49 = vector.shape_cast %48 : vector<1x2x32xf32> to vector<2x32xf32>
      %50 = arith.truncf %49 : vector<2x32xf32> to vector<2x32xbf16>
      %c1_48 = arith.constant 1 : index
      %c0_49 = arith.constant 0 : index
      %c0_50 = arith.constant 0 : index
      %51 = vector.load %arg6[%c1_48, %c0_49, %c0_50] : memref<4x32x64xbf16, #tpu.memory_space<vmem>>, vector<1x32x64xbf16>
      %52 = vector.shape_cast %51 : vector<1x32x64xbf16> to vector<32x64xbf16>
      %cst_51 = arith.constant dense<0.000000e+00> : vector<2x64xf32>
      %53 = tpu.matmul %50, %52, %cst_51 {dimension_numbers = #tpu.dot_dimension_numbers<[1], [0], [0], [1], [0, 0, 1, 1], [], []>} : vector<2x32xbf16>, vector<32x64xbf16>, vector<2x64xf32> -> vector<2x64xf32>
      %54 = arith.addf %47, %53 : vector<2x64xf32>
      %c2_52 = arith.constant 2 : index
      %c0_53 = arith.constant 0 : index
      %c0_54 = arith.constant 0 : index
      %55 = vector.load %arg11[%c2_52, %c0_53, %c0_54] : memref<4x2x32xf32, #tpu.memory_space<vmem>>, vector<1x2x32xf32>
      %56 = vector.shape_cast %55 : vector<1x2x32xf32> to vector<2x32xf32>
      %57 = arith.truncf %56 : vector<2x32xf32> to vector<2x32xbf16>
      %c2_55 = arith.constant 2 : index
      %c0_56 = arith.constant 0 : index
      %c0_57 = arith.constant 0 : index
      %58 = vector.load %arg6[%c2_55, %c0_56, %c0_57] : memref<4x32x64xbf16, #tpu.memory_space<vmem>>, vector<1x32x64xbf16>
      %59 = vector.shape_cast %58 : vector<1x32x64xbf16> to vector<32x64xbf16>
      %cst_58 = arith.constant dense<0.000000e+00> : vector<2x64xf32>
      %60 = tpu.matmul %57, %59, %cst_58 {dimension_numbers = #tpu.dot_dimension_numbers<[1], [0], [0], [1], [0, 0, 1, 1], [], []>} : vector<2x32xbf16>, vector<32x64xbf16>, vector<2x64xf32> -> vector<2x64xf32>
      %61 = arith.addf %54, %60 : vector<2x64xf32>
      %c3_59 = arith.constant 3 : index
      %c0_60 = arith.constant 0 : index
      %c0_61 = arith.constant 0 : index
      %62 = vector.load %arg11[%c3_59, %c0_60, %c0_61] : memref<4x2x32xf32, #tpu.memory_space<vmem>>, vector<1x2x32xf32>
      %63 = vector.shape_cast %62 : vector<1x2x32xf32> to vector<2x32xf32>
      %64 = arith.truncf %63 : vector<2x32xf32> to vector<2x32xbf16>
      %c3_62 = arith.constant 3 : index
      %c0_63 = arith.constant 0 : index
      %c0_64 = arith.constant 0 : index
      %65 = vector.load %arg6[%c3_62, %c0_63, %c0_64] : memref<4x32x64xbf16, #tpu.memory_space<vmem>>, vector<1x32x64xbf16>
      %66 = vector.shape_cast %65 : vector<1x32x64xbf16> to vector<32x64xbf16>
      %cst_65 = arith.constant dense<0.000000e+00> : vector<2x64xf32>
      %67 = tpu.matmul %64, %66, %cst_65 {dimension_numbers = #tpu.dot_dimension_numbers<[1], [0], [0], [1], [0, 0, 1, 1], [], []>} : vector<2x32xbf16>, vector<32x64xbf16>, vector<2x64xf32> -> vector<2x64xf32>
      %68 = arith.addf %61, %67 : vector<2x64xf32>
      %c0_66 = arith.constant 0 : index
      %c0_67 = arith.constant 0 : index
      %69 = vector.load %arg7[%c0_66, %c0_67] : memref<1x64xf32, #tpu.memory_space<vmem>>, vector<1x64xf32>
      %70 = vector.broadcast %69 : vector<1x64xf32> to vector<2x64xf32>
      %71 = arith.addf %68, %70 : vector<2x64xf32>
      %cst_68 = arith.constant 5.000000e-01 : f32
      %72 = vector.broadcast %cst_68 : f32 to vector<2x64xf32>
      %73 = arith.mulf %72, %71 : vector<2x64xf32>
      %cst_69 = arith.constant 0.707106769 : f32
      %74 = vector.broadcast %cst_69 : f32 to vector<2x64xf32>
      %75 = arith.mulf %71, %74 : vector<2x64xf32>
      %76 = math.erf %75 : vector<2x64xf32>
      %cst_70 = arith.constant 1.000000e+00 : f32
      %77 = vector.broadcast %cst_70 : f32 to vector<2x64xf32>
      %78 = arith.addf %77, %76 : vector<2x64xf32>
      %79 = arith.mulf %73, %78 : vector<2x64xf32>
      %80 = arith.truncf %79 : vector<2x64xf32> to vector<2x64xbf16>
      %c0_71 = arith.constant 0 : index
      %c0_72 = arith.constant 0 : index
      %81 = vector.load %arg8[%c0_71, %c0_72] : memref<64x128xbf16, #tpu.memory_space<vmem>>, vector<64x128xbf16>
      %cst_73 = arith.constant dense<0.000000e+00> : vector<2x128xf32>
      %82 = tpu.matmul %80, %81, %cst_73 {dimension_numbers = #tpu.dot_dimension_numbers<[1], [0], [0], [1], [0, 0, 1, 1], [], []>} : vector<2x64xbf16>, vector<64x128xbf16>, vector<2x128xf32> -> vector<2x128xf32>
      %c0_74 = arith.constant 0 : index
      %c0_75 = arith.constant 0 : index
      %83 = vector.load %arg9[%c0_74, %c0_75] : memref<1x128xf32, #tpu.memory_space<vmem>>, vector<1x128xf32>
      %84 = vector.broadcast %83 : vector<1x128xf32> to vector<2x128xf32>
      %85 = arith.addf %82, %84 : vector<2x128xf32>
      %c0_76 = arith.constant 0 : index
      %c0_77 = arith.constant 0 : index
      %86 = vector.load %arg10[%c0_76, %c0_77] : memref<2x128xf32, #tpu.memory_space<vmem>>, vector<2x128xf32>
      tpu.vector_store %arg10[%c0_76, %c0_77], %85 {strides = array<i32>} : memref<2x128xf32, #tpu.memory_space<vmem>>, vector<2x128xf32>,
    } else {
    }
    return
  }
  func.func @transform_0(%arg0: i32, %arg1: i32) -> (i32, i32, i32) {
    %c0_i32 = arith.constant 0 : i32
    %c0_i32_0 = arith.constant 0 : i32
    return %arg0, %arg1, %c0_i32 : i32, i32, i32
  }
  func.func @transform_1(%arg0: i32, %arg1: i32) -> (i32, i32, i32) {
    %c0_i32 = arith.constant 0 : i32
    %c0_i32_0 = arith.constant 0 : i32
    return %arg0, %arg1, %c0_i32 : i32, i32, i32
  }
  func.func @transform_2(%arg0: i32, %arg1: i32) -> (i32, i32, i32) {
    %c0_i32 = arith.constant 0 : i32
    %c0_i32_0 = arith.constant 0 : i32
    return %arg0, %arg1, %c0_i32 : i32, i32, i32
  }
  func.func @transform_3(%arg0: i32, %arg1: i32) -> (i32, i32, i32) {
    %c0_i32 = arith.constant 0 : i32
    %c0_i32_0 = arith.constant 0 : i32
    return %arg0, %arg1, %c0_i32 : i32, i32, i32
  }
  func.func @transform_4(%arg0: i32, %arg1: i32) -> (i32, i32, i32) {
    %c0_i32 = arith.constant 0 : i32
    %c0_i32_0 = arith.constant 0 : i32
    %c0_i32_1 = arith.constant 0 : i32
    %c0_i32_2 = arith.constant 0 : i32
    return %c0_i32, %c0_i32_0, %c0_i32_1 : i32, i32, i32
  }
  func.func @transform_5(%arg0: i32, %arg1: i32) -> (i32, i32) {
    %c0_i32 = arith.constant 0 : i32
    %c0_i32_0 = arith.constant 0 : i32
    %c0_i32_1 = arith.constant 0 : i32
    return %c0_i32, %c0_i32_0 : i32, i32
  }
  func.func @transform_6(%arg0: i32, %arg1: i32) -> (i32, i32) {
    %c0_i32 = arith.constant 0 : i32
    %c0_i32_0 = arith.constant 0 : i32
    %c0_i32_1 = arith.constant 0 : i32
    return %c0_i32, %c0_i32_0 : i32, i32
  }
  func.func @transform_7(%arg0: i32, %arg1: i32) -> (i32, i32) {
    %c0_i32 = arith.constant 0 : i32
    %c0_i32_0 = arith.constant 0 : i32
    %c0_i32_1 = arith.constant 0 : i32
    return %c0_i32, %c0_i32_0 : i32, i32
  }
  func.func @transform_8(%arg0: i32, %arg1: i32) -> (i32, i32) {
    %c0_i32 = arith.constant 0 : i32
    %c0_i32_0 = arith.constant 0 : i32
    return %arg0, %c0_i32 : i32, i32
  }
}

</mosaic_0001>

<bundles_post_ra>
// kernel: tpu_custom_call.1
= control target key start
LH: loop header
LB: loop body
LE: loop exit
PB: predicated region body
PF: predicated region fallthrough
CT: control target
= control target key end

     0   :  { %13 = vsyncpa [#allocation4], 0  ;;  %s906_s0 = inlined_call_operand.hbm [shape: bf16[2,8,32], index: 0, kind: input, shape index: {}]   ;;  %s907_s1 = inlined_call_operand.hbm [shape: bf16[2,8,32], index: 1, kind: input, shape index: {}]   ;;  %s908_s2 = inlined_call_operand.hbm [shape: bf16[2,8,32], index: 2, kind: input, shape index: {}]   ;;  %s909_s3 = inlined_call_operand.hbm [shape: bf16[2,8,32], index: 3, kind: input, shape index: {}]   ;;  %s910_s4 = inlined_call_operand.hbm [shape: bf16[4,32,64], index: 4, kind: input, shape index: {}]   ;;  %s911_s5 = inlined_call_operand.vmem [shape: f32[1,64], index: 5, kind: input, shape index: {}]   ;;  %s912_s6 = inlined_call_operand.hbm [shape: bf16[64,128], index: 6, kind: input, shape index: {}]   ;;  %s913_s7 = inlined_call_operand.vmem [shape: f32[1,128], index: 7, kind: input, shape index: {}]   ;;  %s914_s8 = inlined_call_operand.hbm [shape: f32[2,128], index: 8, kind: output, shape index: {}]  }
   0x1   :  { %14 = vsyncpa [#allocation7], 0 }
   0x2   :  { %15 = vsyncpa [#allocation10], 0 }
   0x3   :  { %16 = vsyncpa [#allocation13], 0 }
   0x4   :  { %17 = vsyncpa [#allocation5], 0  ;;  %s35_s29 = sshll.u32 %s907_s1, 4  ;;  %s782_s30 = smov [#allocation6]   ;;  %s36_s29 = int_to_ptr.hbm [resolvable:$true] %s35_s29 }
   0x5   :  { %s37_s9 = sshll.u32 %s782_s30, 4  ;;  %s61_s12 = sshll.u32 %s909_s3, 4  ;;  %s38_s9 = int_to_ptr.vmem [resolvable:$true] %s37_s9  ;;  %s62_s12 = int_to_ptr.hbm [resolvable:$true] %s61_s12 }
   0x6   :  { %s783_s13 = smov 64   ;;  %s784_s14 = smov 4  }
   0x7   :  { %43 = dma.hbm_to_vmem [thread:$0]  %s36_s29, 128, %s38_s9, [#allocation7], %s783_s13, %s783_s13, %s784_s14  }
   0x8   :  { %s785_s15 = smov [#allocation9]   ;;  %s22_s1 = sshll.u32 %s906_s0, 4  ;;  %s23_s1 = int_to_ptr.hbm [resolvable:$true] %s22_s1 }
   0x9   :  { %s63_s16 = sshll.u32 %s785_s15, 4  ;;  %s48_s20 = sshll.u32 %s908_s2, 4  ;;  %s64_s16 = int_to_ptr.vmem [resolvable:$true] %s63_s16  ;;  %s49_s20 = int_to_ptr.hbm [resolvable:$true] %s48_s20 }
   0xa   :  { %69 = dma.hbm_to_vmem [thread:$0]  %s62_s12, 128, %s64_s16, [#allocation10], %s783_s13, %s783_s13, %s784_s14  }
   0xb   :  { %s786_s21 = smov [#allocation3]   ;;  %s787_s23 = smov [#allocation8]  }
   0xc   :  { %s24_s22 = sshll.u32 %s786_s21, 4  ;;  %s50_s0 = sshll.u32 %s787_s23, 4  ;;  %s25_s22 = int_to_ptr.vmem [resolvable:$true] %s24_s22  ;;  %s51_s0 = int_to_ptr.vmem [resolvable:$true] %s50_s0 }
   0xd   :  { %30 = dma.hbm_to_vmem [thread:$0]  %s23_s1, 128, %s25_s22, [#allocation4], %s783_s13, %s783_s13, %s784_s14  }
   0xe   :  { %s74_s26 = sshll.u32 %s910_s4, 4  ;;  %s89_s28 = sshll.u32 %s912_s6, 4  ;;  %s75_s26 = int_to_ptr.hbm [resolvable:$true] %s74_s26  ;;  %s90_s28 = int_to_ptr.hbm [resolvable:$true] %s89_s28 }
   0xf   :  { %56 = dma.hbm_to_vmem [thread:$0]  %s49_s20, 128, %s51_s0, [#allocation7], %s783_s13, %s783_s13, %s784_s14  }
  0x10   :  { %s788_s29 = smov [#allocation11]   ;;  %s789_s9 = smov [#allocation12]  }
  0x11   :  { %s76_s30 = sshll.u32 %s788_s29, 4  ;;  %s91_s4 = sshll.u32 %s789_s9, 4  ;;  %s77_s30 = int_to_ptr.vmem [resolvable:$true] %s76_s30  ;;  %s92_s4 = int_to_ptr.vmem [resolvable:$true] %s91_s4 }
  0x12   :  { %82 = dma.hbm_to_vmem [thread:$0]  %s75_s26, 1024, %s77_s30, [#allocation10], %s783_s13, %s783_s13, %s784_s14  }
  0x13   :  { %97 = dma.hbm_to_vmem [thread:$0]  %s90_s28, 512, %s92_s4, [#allocation13], %s783_s13, %s783_s13, %s784_s14  }
  0x14   :  { %772 = dma.done.wait [#allocation4], 128  }
  0x15   :  { %773 = vsyncadd [#allocation4], 4294967168 }
  0x16   :  { %774 = dma.done.wait [#allocation7], 256  }
  0x17   :  { %775 = vsyncadd [#allocation7], 4294967040 }
  0x18   :  { %776 = dma.done.wait [#allocation10], 1152  }
  0x19   :  { %777 = vsyncadd [#allocation10], 4294966144 }
  0x1a   :  { %778 = dma.done.wait [#allocation13], 512  }
  0x1b   :  { %779 = vsyncadd [#allocation13], 4294966784  ;;  %vm129_vm0 = vcmask 254976   ;;  %v790_v0 = vmov 0.0   ;;  %v565_v1 = vld [vmem:[#allocation11 + $0x18] sm:$0xff]  ;;  %v563_v2 = vld [vmem:[#allocation11 + $0x8] sm:$0xff] }
  0x1c   :  { %131 = vst.msk [vmem:[#allocation2 + $0x2] sm:$0x3] %vm129_vm0, %v790_v0  ;;  %v567_v3 = vld [vmem:[#allocation11 + $0x28] sm:$0xff]  ;;  %v569_v4 = vld [vmem:[#allocation11 + $0x38] sm:$0xff]  ;;  %277 = vmatpush.bf16.msra.mxu0 %v565_v1  ;;  %305 = vmatpush.bf16.msra.mxu1 %v563_v2  ;;  %v564_v5 = vld [vmem:[#allocation11 + $0x10] sm:$0xff]  ;;  %vm139_vm1 = vcmask 261120  }
  0x1d   :  { %130 = vst.msk [vmem:[#allocation2] sm:$0x3] %vm129_vm0, %v790_v0  ;;  %v562_v6 = vld [vmem:[#allocation11] sm:$0xff]  ;;  %340 = vmatpush.bf16.msra.mxu2 %v567_v3  ;;  %376 = vmatpush.bf16.msra.mxu3 %v569_v4  ;;  %v568_v8 = vld [vmem:[#allocation11 + $0x30] sm:$0xff]  ;;  %v579_v9 = vld [vmem:[#allocation6] sm:$0xff]   ;;  %vm156_vm2 = vcmask 1041409  }
  0x1e   :  { %132 = vst.msk [vmem:[#allocation2 + $0x4] sm:$0x3] %vm129_vm0, %v790_v0  ;;  %v566_v7 = vld [vmem:[#allocation11 + $0x20] sm:$0xff]  ;;  %v580_v11 = vunpack.c.l.bf16 %v579_v9  ;;  %v581_v12 = vunpack.c.h.bf16 %v579_v9  ;;  %v583_v15 = vld [vmem:[#allocation8] sm:$0xff]   ;;  %v587_v18 = vld [vmem:[#allocation9] sm:$0xff]   ;;  %vm470_vm7 = vcmask 523264  }
  0x1f   :  { %133 = vst.msk [vmem:[#allocation2 + $0x6] sm:$0x3] %vm129_vm0, %v790_v0  ;;  %v575_v10 = vld [vmem:[#allocation3] sm:$0xff]   ;;  %v584_v16 = vunpack.c.l.bf16 %v583_v15  ;;  %v585_v17 = vunpack.c.h.bf16 %v583_v15  ;;  %v588_v29 = vunpack.c.l.bf16 %v587_v18  ;;  %v589_v30 = vunpack.c.h.bf16 %v587_v18  ;;  %s791_s12 = smov [#allocation14]   ;;  %s495_s16 = sshll.u32 %s914_s8, 4  ;;  %s496_s16 = int_to_ptr.hbm [resolvable:$true] %s495_s16 }
  0x20   :  { %v576_v13 = vunpack.c.l.bf16 %v575_v10  ;;  %v577_v14 = vunpack.c.h.bf16 %v575_v10  ;;  %278 = vmatpush.bf16.msra.mxu0 %v564_v5  ;;  %306 = vmatpush.bf16.msra.mxu1 %v562_v6  ;;  %v168_v19 = vsel %vm139_vm1, %v580_v11, 0.0  ;;  %v175_v20 = vsel %vm139_vm1, %v581_v12, 0.0  ;;  %s493_s13 = sshll.u32 %s791_s12, 4  ;;  %s494_s13 = int_to_ptr.vmem [resolvable:$true] %s493_s13 }
  0x21   :  { %341 = vmatpush.bf16.msra.mxu2 %v566_v7  ;;  %377 = vmatpush.bf16.msra.mxu3 %v568_v8  ;;  %v169_v23 = vrot.slane %v168_v19, 4  ;;  %v176_v24 = vrot.slane %v175_v20, 4  ;;  %v194_v27 = vsel %vm139_vm1, %v584_v16, 0.0  ;;  %v201_v28 = vsel %vm139_vm1, %v585_v17, 0.0 }
  0x22   :  { %v140_v21 = vsel %vm139_vm1, %v576_v13, 0.0  ;;  %v147_v22 = vsel %vm139_vm1, %v577_v14, 0.0  ;;  %v195_v35 = vrot.slane %v194_v27, 4  ;;  %v202_v36 = vrot.slane %v201_v28, 4 }
  0x23   :  { %v141_v25 = vrot.slane %v140_v21, 4  ;;  %v148_v26 = vrot.slane %v147_v22, 4  ;;  %v170_v31 = vadd.f32 %v169_v23, %v168_v19  ;;  %v177_v32 = vadd.f32 %v176_v24, %v175_v20  ;;  %v163_v63 = vld [vmem:[#allocation2 + $0x2] sm:$0x3] }
  0x24   :  { %v220_v37 = vsel %vm139_vm1, %v588_v29, 0.0  ;;  %v227_v38 = vsel %vm139_vm1, %v589_v30, 0.0  ;;  %v196_v43 = vadd.f32 %v195_v35, %v194_v27  ;;  %v203_v44 = vadd.f32 %v202_v36, %v201_v28  ;;  %v134_v2 = vld [vmem:[#allocation2] sm:$0x3] }
  0x25   :  { %v142_v33 = vadd.f32 %v141_v25, %v140_v21  ;;  %v149_v34 = vadd.f32 %v148_v26, %v147_v22  ;;  %v171_v39 = vrot.slane %v170_v31, 2  ;;  %v178_v40 = vrot.slane %v177_v32, 2  ;;  %v189_v13 = vld [vmem:[#allocation2 + $0x4] sm:$0x3] }
  0x26   :  { %v221_v45 = vrot.slane %v220_v37, 4  ;;  %v228_v46 = vrot.slane %v227_v38, 4  ;;  %v197_v51 = vrot.slane %v196_v43, 2  ;;  %v204_v52 = vrot.slane %v203_v44, 2  ;;  %v215_v20 = vld [vmem:[#allocation2 + $0x6] sm:$0x3] }
  0x27   :  { %v143_v41 = vrot.slane %v142_v33, 2  ;;  %v150_v42 = vrot.slane %v149_v34, 2  ;;  %v172_v47 = vadd.f32 %v171_v39, %v170_v31  ;;  %v179_v48 = vadd.f32 %v178_v40, %v177_v32  ;;  %v600_v40 = vld [vmem:[%s911_s5] ss:$0 sm:$0xff] }
  0x28   :  { %v222_v53 = vadd.f32 %v221_v45, %v220_v37  ;;  %v229_v54 = vadd.f32 %v228_v46, %v227_v38  ;;  %v198_v59 = vadd.f32 %v197_v51, %v196_v43  ;;  %v205_v60 = vadd.f32 %v204_v52, %v203_v44  ;;  %v573_v51 = vld [vmem:[#allocation12 + $0x18] sm:$0xff] }
  0x29   :  { %v144_v49 = vadd.f32 %v143_v41, %v142_v33  ;;  %v151_v50 = vadd.f32 %v150_v42, %v149_v34  ;;  %v173_v55 = vrot.slane %v172_v47, 1  ;;  %v180_v56 = vrot.slane %v179_v48, 1  ;;  %478 = vmatpush.bf16.msrb.mxu0 %v573_v51 }
  0x2a   :  { %v223_v61 = vrot.slane %v222_v53, 2  ;;  %v230_v62 = vrot.slane %v229_v54, 2  ;;  %v199_v5 = vrot.slane %v198_v59, 1  ;;  %v206_v6 = vrot.slane %v205_v60, 1 }
  0x2b   :  { %v145_v57 = vrot.slane %v144_v49, 1  ;;  %v152_v58 = vrot.slane %v151_v50, 1  ;;  %v174_v0 = vadd.f32 %v173_v55, %v172_v47  ;;  %v181_v1 = vadd.f32 %v180_v56, %v179_v48  ;;  %v572_v56 = vld [vmem:[#allocation12 + $0x10] sm:$0xff] }
  0x2c   :  { %v224_v7 = vadd.f32 %v223_v61, %v222_v53  ;;  %v231_v8 = vadd.f32 %v230_v62, %v229_v54  ;;  %v200_v14 = vadd.f32 %v199_v5, %v198_v59  ;;  %v207_v15 = vadd.f32 %v206_v6, %v205_v60  ;;  %v571_v60 = vld [vmem:[#allocation12 + $0x8] sm:$0xff] }
  0x2d   :  { %v146_v3 = vadd.f32 %v145_v57, %v144_v49  ;;  %v153_v4 = vadd.f32 %v152_v58, %v151_v50  ;;  %v184_v9 = vsel %vm156_vm2, %v181_v1, %v174_v0  ;;  %479 = vmatpush.bf16.msrb.mxu0 %v572_v56  ;;  %v570_v0 = vld [vmem:[#allocation12] sm:$0xff] }
  0x2e   :  { %v186_v11 = vadd.f32 %v184_v9, %v163_v63  ;;  %v225_v16 = vrot.slane %v224_v7, 1  ;;  %v232_v17 = vrot.slane %v231_v8, 1  ;;  %v210_v18 = vsel %vm156_vm2, %v207_v15, %v200_v14 }
  0x2f   :  { %v157_v10 = vsel %vm156_vm2, %v153_v4, %v146_v3  ;;  %v212_v19 = vadd.f32 %v210_v18, %v189_v13 }
  0x30   :  { %v159_v12 = vadd.f32 %v157_v10, %v134_v2  ;;  %187 = vst.msk [vmem:[#allocation2 + $0x2] sm:$0x3] %vm129_vm0, %v186_v11  ;;  %v226_v21 = vadd.f32 %v225_v16, %v224_v7  ;;  %v233_v22 = vadd.f32 %v232_v17, %v231_v8 }
  0x31   :  { %213 = vst.msk [vmem:[#allocation2 + $0x4] sm:$0x3] %vm129_vm0, %v212_v19  ;;  %480 = vmatpush.bf16.msrb.mxu0 %v571_v60 }
  0x32   :  { %161 = vst.msk [vmem:[#allocation2] sm:$0x3] %vm129_vm0, %v159_v12  ;;  %v236_v23 = vsel %vm156_vm2, %v233_v22, %v226_v21 }
  0x33   :  { %v238_v24 = vadd.f32 %v236_v23, %v215_v20 }
  0x35   :  { %239 = vst.msk [vmem:[#allocation2 + $0x6] sm:$0x3] %vm129_vm0, %v238_v24  ;;  %481 = vmatpush.bf16.msrb.mxu0 %v570_v0 }
  0x37   :  { %v249_v25 = vld [vmem:[#allocation2 + $0x2] sm:$0x3] }
  0x38   :  { %v250_v26 = vpack.c.bf16 %v249_v25, %v249_v25  ;;  %v312_v29 = vld [vmem:[#allocation2 + $0x4] sm:$0x3] }
  0x39   :  { %v243_v27 = vld [vmem:[#allocation2] sm:$0x3]  ;;  %v313_v30 = vpack.c.bf16 %v312_v29, %v312_v29 }
  0x3a   :  { %v244_v28 = vpack.c.bf16 %v243_v27, %v243_v27  ;;  %516 = vmatmul.msk.bf16.vlgmr.msra.gmra.mxu0 %vm139_vm1, %v250_v26  ;;  %v601_v26 = vld [vmem:[%s913_s7] ss:$0 sm:$0xff] }
  0x3b   :  { %534 = vmatmul.msk.bf16.vlgmr.msra.gmra.mxu2 %vm139_vm1, %v313_v30 }
  0x3c   :  { %525 = vmatmul.msk.bf16.vlgmr.msra.gmra.mxu1 %vm139_vm1, %v244_v28  ;;  %v348_v31 = vld [vmem:[#allocation2 + $0x6] sm:$0x3] }
  0x3d   :  { %v349_v32 = vpack.c.bf16 %v348_v31, %v348_v31 }
  0x3f   :  { %543 = vmatmul.msk.bf16.vlgmr.msra.gmra.mxu3 %vm139_vm1, %v349_v32 }
  0xb7   :  { %v280_v33 = vpop.f32.mrf.mxu0 }
  0xb9   :  { %v308_v34 = vpop.f32.mrf.mxu1 }
  0xba   :  { %v309_v35 = vadd.f32 %v308_v34, %v280_v33 }
  0xbe   :  { %v343_v37 = vpop.f32.mrf.mxu2 }
  0xbf   :  { %v282_v36 = vpop.f32.mrf.mxu0  ;;  %v347_v39 = vadd.f32 %v343_v37, %v309_v35 }
  0xc1   :  { %v310_v38 = vpop.f32.mrf.mxu1 }
  0xc2   :  { %v379_v41 = vpop.f32.mrf.mxu3 }
  0xc3   :  { %v383_v42 = vadd.f32 %v379_v41, %v347_v39 }
  0xc5   :  { %v388_v43 = vadd.f32 %v600_v40, %v383_v42 }
  0xc6   :  { %v345_v45 = vpop.f32.mrf.mxu2 }
  0xc7   :  { %v390_v44 = vmul.f32 0.70710677, %v388_v43  ;;  %v389_v22 = vmul.f32 0.5, %v388_v43 }
  0xc9   :  { %v391_v46 = vmul.f32 %v390_v44, %v390_v44 }
  0xca   :  { %v381_v47 = vpop.f32.mrf.mxu3 }
  0xcb   :  { %v392_v48 = vmin.f32 %v391_v46, 16.0 }
  0xcd   :  { %v393_v49 = vmul.f32 2.1237322e-06, %v392_v48  ;;  %v404_v50 = vmul.f32 3.8918573e-05, %v392_v48 }
  0xcf   :  { %v394_v52 = vadd.f32 0.00028619796, %v393_v49  ;;  %v405_v53 = vadd.f32 0.001143296, %v404_v50 }
  0xd1   :  { %v395_v54 = vmul.f32 %v394_v52, %v392_v48  ;;  %v406_v55 = vmul.f32 %v405_v53, %v392_v48 }
  0xd3   :  { %v407_v57 = vadd.f32 0.014752088, %v406_v55  ;;  %v396_v58 = vadd.f32 0.0036580483, %v395_v54 }
  0xd5   :  { %v408_v59 = vmul.f32 %v407_v57, %v392_v48  ;;  %v397_v62 = vmul.f32 %v396_v58, %v392_v48 }
  0xd7   :  { %v409_v61 = vadd.f32 0.112945676, %v408_v59  ;;  %v398_v2 = vadd.f32 0.05243302, %v397_v62 }
  0xd9   :  { %v410_v63 = vmul.f32 %v409_v61, %v392_v48  ;;  %v399_v5 = vmul.f32 %v398_v2, %v392_v48 }
  0xdb   :  { %v411_v1 = vadd.f32 0.4994258, %v410_v63  ;;  %v400_v6 = vadd.f32 0.18741608, %v399_v5 }
  0xdd   :  { %v412_v3 = vmul.f32 %v411_v1, %v392_v48  ;;  %v401_v8 = vmul.f32 %v400_v6, %v392_v48 }
  0xdf   :  { %v413_v4 = vadd.f32 1.0, %v412_v3  ;;  %v402_v12 = vadd.f32 1.1283791, %v401_v8 }
  0xe1   :  { %602 = vrcp.f32 %v413_v4  ;;  %v425_v11 = vand.u32 2147483648, %v413_v4  ;;  %v423_v14 = vand.u32 2147483647, %v413_v4  ;;  %vm419_vm4 = vweird.f32 %v413_v4 }
  0xe2   :  { %v403_v17 = vmul.f32 %v402_v12, %v390_v44 }
  0xe3   :  { %v426_v16 = vor.u32 1.1754944e-38, %v425_v11  ;;  %vm424_vm6 = vcmp.eq.f32.partialorder %v423_v14, 8.507059e+37 }
  0xe7   :  { %v603_v7 = vpop.eup %602 }
  0xe8   :  { %v415_v9 = vmul.f32 %v603_v7, %v413_v4  ;;  %vm420_vm3 = vweird.f32 %v603_v7 }
  0xe9   :  { %vm421_vm5 = vmor %vm419_vm4, %vm420_vm3 }
  0xea   :  { %v416_v10 = vsub.f32 1.0, %v415_v9 }
  0xec   :  { %v417_v13 = vmul.f32 %v603_v7, %v416_v10 }
  0xee   :  { %v418_v15 = vadd.f32 %v603_v7, %v417_v13 }
  0xf0   :  { %v422_v18 = vsel %vm421_vm5, %v603_v7, %v418_v15 }
  0xf1   :  { %v427_v19 = vsel %vm424_vm6, %v426_v16, %v422_v18 }
  0xf2   :  { %v428_v20 = vmul.f32 %v427_v19, %v403_v17 }
  0xf4   :  { %v544_v21 = vclamps-f32 %v428_v20, 1.0 }
  0xf6   :  { %v431_v23 = vadd.f32 1.0, %v544_v21 }
  0xf8   :  { %v432_v24 = vmul.f32 %v431_v23, %v389_v22 }
  0xfa   :  { %v433_v25 = vpack.c.bf16 %v432_v24, %v432_v24 }
  0xfc   :  { %561 = vmatmul.msk.bf16.vlgmr.msrb.gmra.mxu0 %vm470_vm7, %v433_v25 }
 0x179   :  { %v483_v27 = vpop.f32.mrf.mxu0 }
 0x17a   :  { %v484_v28 = vadd.f32 %v601_v26, %v483_v27 }
 0x17c   :  { %487 = vst [vmem:[#allocation14] sm:$0x3] %v484_v28 }
 0x17d   :  { %498 = dma.vmem_to_hbm [thread:$0]  %s494_s13, 32, %s496_s16, [#allocation5]  }
 0x181   :  { %v485_v29 = vpop.f32.mrf.mxu0 }
 0x182   :  { %780 = dma.done.wait [#allocation5], 32  }
 0x183   :  { %781 = vsyncadd [#allocation5], 4294967264 }
 0x184   :  { %503 = vsyncpa [#allocation4], 1 }
 0x185   :  { %504 = vsyncpa [#allocation7], 1 }
 0x186   :  { %505 = vsyncpa [#allocation10], 1 }
 0x187   :  { %506 = vsyncpa [#allocation13], 1 }
 0x188   :  { %507 = vsyncpa [#allocation5], 1 }

</bundles_post_ra>
